<compile_context>
chip_gen: v6e
topology: v6e:2x2x1
jax: 0.10.0
libtpu: 0.0.40
codegen_flags: <defaults>
</compile_context>

<pallas_src>
import math

import jax
import jax.numpy as jnp
import numpy as np
from jax import lax
from jax.experimental import pallas as pl
from jax.experimental.pallas import tpu as pltpu

_HALF_LOG_2PI = 0.5 * math.log(2.0 * math.pi)
_VMEM_LIMIT_BYTES = 32 * 1024 * 1024   # scoped-safe on v5e/v6e AND v7x (64 MiB phys)
_MATERIALIZE_GRID_M = 2                # materialize sampled W when Mp//tm > this


# ---------------------------------------------------------------------------
# Small helpers
# ---------------------------------------------------------------------------
def _round_up(x, m):
    return (x + m - 1) // m * m


def _pad2d(a, rows, cols):
    r, c = a.shape
    if r == rows and c == cols:
        return a
    return jnp.pad(a, ((0, rows - r), (0, cols - c)))


def _softplus(x):
    # numerically stable softplus == log(1 + exp(x))
    return jnp.maximum(x, 0.0) + jnp.log(1.0 + jnp.exp(-jnp.abs(x)))


def _mixture_constants(pi, sigma_1, sigma_2):
    # fold mixture constants: log p_i(w) = c_i - k_i * w^2
    c1 = -_HALF_LOG_2PI - math.log(float(sigma_1) + 1e-10)
    k1 = 1.0 / (2.0 * float(sigma_1) ** 2 + 1e-10)
    c2 = -_HALF_LOG_2PI - math.log(float(sigma_2) + 1e-10)
    k2 = 1.0 / (2.0 * float(sigma_2) ** 2 + 1e-10)
    return float(pi), c1, k1, c2, k2


# ---------------------------------------------------------------------------
# Fused (sample +) linear kernel: y = x @ (mu + eps*softplus(rho)) + b
# ---------------------------------------------------------------------------
def _make_linear_kernel(sample):
    if sample:
        def kernel(x_ref, wmu_ref, wrho_ref, epsw_ref,
                   bmu_ref, brho_ref, epsb_ref, o_ref):
            k = pl.program_id(2)

            @pl.when(k == 0)
            def _():
                o_ref[...] = jnp.zeros_like(o_ref)

            # fused reparameterized sampling (f32 math), bf16 MXU feed,
            # f32 accumulation directly in the VMEM-resident output block.
            w = wmu_ref[...] + epsw_ref[...] * _softplus(wrho_ref[...])
            o_ref[...] += jnp.dot(x_ref[...].astype(jnp.bfloat16),
                                  w.astype(jnp.bfloat16),
                                  preferred_element_type=jnp.float32)

            @pl.when(k == pl.num_programs(2) - 1)
            def _():
                b = bmu_ref[...] + epsb_ref[...] * _softplus(brho_ref[...])
                o_ref[...] += b
    else:
        def kernel(x_ref, w_ref, b_ref, o_ref):
            k = pl.program_id(2)

            @pl.when(k == 0)
            def _():
                o_ref[...] = jnp.zeros_like(o_ref)

            o_ref[...] += jnp.dot(x_ref[...].astype(jnp.bfloat16),
                                  w_ref[...].astype(jnp.bfloat16),
                                  preferred_element_type=jnp.float32)

            @pl.when(k == pl.num_programs(2) - 1)
            def _():
                o_ref[...] += b_ref[...]
    return kernel


def _sample_weight_kernel(mu_ref, rho_ref, eps_ref, w_ref):
    w = mu_ref[...] + eps_ref[...] * _softplus(rho_ref[...])
    w_ref[...] = w.astype(w_ref.dtype)


def _materialize_sampled_weights(wmup, wrhop, epswp, tk, tn):
    """One-shot elementwise sampling of W (bf16 output) for the large-M path."""
    Kp, Np = wmup.shape
    spec = pl.BlockSpec((tk, tn), lambda i, j: (i, j))
    n_elems = Kp * Np
    return pl.pallas_call(
        _sample_weight_kernel,
        out_shape=jax.ShapeDtypeStruct((Kp, Np), jnp.bfloat16),
        grid_spec=pltpu.PrefetchScalarGridSpec(
            num_scalar_prefetch=0,
            grid=(Kp // tk, Np // tn),
            in_specs=[spec, spec, spec],
            out_specs=spec,
        ),
        compiler_params=pltpu.CompilerParams(
            dimension_semantics=("parallel", "parallel"),
            vmem_limit_bytes=_VMEM_LIMIT_BYTES,
        ),
        cost_estimate=pl.CostEstimate(flops=4 * n_elems,
                                      transcendentals=2 * n_elems,
                                      bytes_accessed=3 * 4 * n_elems + 2 * n_elems),
    )(wmup, wrhop, epswp)


def bayesian_linear_forward(x, w_mu, w_rho, b_mu, b_rho, eps_w=None, eps_b=None):
    """y = x @ W + b with W, b sampled (in-kernel or materialized) when eps_* given."""
    sample = eps_w is not None
    if sample:
        assert eps_b is not None

    x = x.astype(jnp.float32)
    M, K = x.shape
    K2, N = w_mu.shape
    assert K == K2

    # MXU-friendly large tiles; lane-dense (>=128) padded N.
    tm = min(_round_up(M, 8), 512)
    tn = min(_round_up(N, 128), 512)
    tk = min(_round_up(K, 128), 1024)
    Mp, Kp, Np = _round_up(M, tm), _round_up(K, tk), _round_up(N, tn)
    gm, gn, gk = Mp // tm, Np // tn, Kp // tk
    grid = (gm, gn, gk)

    xp = _pad2d(x, Mp, Kp)
    wmup = _pad2d(w_mu.astype(jnp.float32), Kp, Np)
    bmup = _pad2d(b_mu.astype(jnp.float32).reshape(1, N), 1, Np)

    x_spec = pl.BlockSpec((tm, tk), lambda i, j, k: (i, k))
    w_spec = pl.BlockSpec((tk, tn), lambda i, j, k: (k, j))
    b_spec = pl.BlockSpec((1, tn), lambda i, j, k: (0, j))
    o_spec = pl.BlockSpec((tm, tn), lambda i, j, k: (i, j))
    matmul_flops = 2 * Mp * Np * Kp

    if sample and gm > _MATERIALIZE_GRID_M:
        # Many row tiles: fusing the sampling would re-stream + re-softplus the
        # three KxN f32 arrays gm times.  Materialize the sample once (bf16).
        wrhop = _pad2d(w_rho.astype(jnp.float32), Kp, Np)
        epswp = _pad2d(eps_w.astype(jnp.float32), Kp, Np)
        w_in = _materialize_sampled_weights(wmup, wrhop, epswp, tk, tn)
        b_sampled = (b_mu.astype(jnp.float32)
                     + eps_b.astype(jnp.float32) * _softplus(b_rho.astype(jnp.float32)))
        bp = _pad2d(b_sampled.reshape(1, N), 1, Np)
        inputs = (xp, w_in, bp)
        in_specs = [x_spec, w_spec, b_spec]
        kernel = _make_linear_kernel(False)
        flops = matmul_flops
        transcendentals = 0
        bytes_accessed = (4 * Mp * Kp * gn + 2 * Kp * Np * gm
                          + 4 * Np * gm * gn + 4 * Mp * Np)
    elif sample:
        wrhop = _pad2d(w_rho.astype(jnp.float32), Kp, Np)
        epswp = _pad2d(eps_w.astype(jnp.float32), Kp, Np)
        brhop = _pad2d(b_rho.astype(jnp.float32).reshape(1, N), 1, Np)
        epsbp = _pad2d(eps_b.astype(jnp.float32).reshape(1, N), 1, Np)
        inputs = (xp, wmup, wrhop, epswp, bmup, brhop, epsbp)
        in_specs = [x_spec, w_spec, w_spec, w_spec, b_spec, b_spec, b_spec]
        kernel = _make_linear_kernel(True)
        # weight streams are re-read and re-sampled once per row tile (gm <= 2 here)
        flops = matmul_flops + 4 * Kp * Np * gm
        transcendentals = 2 * Kp * Np * gm
        bytes_accessed = (4 * Mp * Kp * gn + 3 * 4 * Kp * Np * gm
                          + 3 * 4 * Np * gm * gn + 4 * Mp * Np)
    else:
        inputs = (xp, wmup, bmup)
        in_specs = [x_spec, w_spec, b_spec]
        kernel = _make_linear_kernel(False)
        flops = matmul_flops
        transcendentals = 0
        bytes_accessed = (4 * Mp * Kp * gn + 4 * Kp * Np * gm
                          + 4 * Np * gm * gn + 4 * Mp * Np)

    out = pl.pallas_call(
        kernel,
        out_shape=jax.ShapeDtypeStruct((Mp, Np), jnp.float32),
        grid_spec=pltpu.PrefetchScalarGridSpec(
            num_scalar_prefetch=0,
            grid=grid,
            in_specs=in_specs,
            out_specs=o_spec,
        ),
        compiler_params=pltpu.CompilerParams(
            dimension_semantics=("parallel", "parallel", "arbitrary"),
            vmem_limit_bytes=_VMEM_LIMIT_BYTES,
        ),
        cost_estimate=pl.CostEstimate(flops=flops,
                                      transcendentals=transcendentals,
                                      bytes_accessed=bytes_accessed),
    )(*inputs)
    return out[:M, :N]


# ---------------------------------------------------------------------------
# Fused (sample +) log-prior / log-posterior kernel for the weight matrix
# ---------------------------------------------------------------------------
def _make_logprob_kernel(pi, sigma_1, sigma_2, K, N, tk, tn, sample):
    pi, c1, k1, c2, k2 = _mixture_constants(pi, sigma_1, sigma_2)

    def mixture_logp(w):
        w2 = w * w
        return jnp.log(pi * jnp.exp(c1 - k1 * w2)
                       + (1.0 - pi) * jnp.exp(c2 - k2 * w2) + 1e-10)

    def posterior_logp(sigma, diff):
        # diff == w - mu (== eps * sigma when sampling, 0 otherwise)
        return (-_HALF_LOG_2PI - jnp.log(sigma + 1e-10)
                - diff * diff / (2.0 * sigma * sigma + 1e-10))

    def compute(wmu_ref, wrho_ref, epsw_ref, p_ref, q_ref, p_acc, q_acc):
        kb = pl.program_id(0)
        nb = pl.program_id(1)

        @pl.when(nb == 0)
        def _():
            p_acc[...] = jnp.zeros_like(p_acc)
            q_acc[...] = jnp.zeros_like(q_acc)

        # mask padded rows/cols so the means stay exact
        rows = kb * tk + lax.broadcasted_iota(jnp.int32, (tk, tn), 0)
        cols = nb * tn + lax.broadcasted_iota(jnp.int32, (tk, tn), 1)
        mask = jnp.logical_and(rows < K, cols < N)

        mu = wmu_ref[...]
        sigma = _softplus(wrho_ref[...])
        diff = epsw_ref[...] * sigma if sample else jnp.zeros_like(mu)
        w = mu + diff

        zeros = jnp.zeros_like(mu)
        # per-step work is purely elementwise (VPU); the single cross-lane
        # reduction + lane-dense store happens only once per kb below.
        p_acc[...] += jnp.where(mask, mixture_logp(w), zeros)
        q_acc[...] += jnp.where(mask, posterior_logp(sigma, diff), zeros)

        @pl.when(nb == pl.num_programs(1) - 1)
        def _():
            p_ref[...] = jnp.broadcast_to(jnp.sum(p_acc[...]), (1, 8, 128))
            q_ref[...] = jnp.broadcast_to(jnp.sum(q_acc[...]), (1, 8, 128))

    if sample:
        def kernel(wmu_ref, wrho_ref, epsw_ref, p_ref, q_ref, p_acc, q_acc):
            compute(wmu_ref, wrho_ref, epsw_ref, p_ref, q_ref, p_acc, q_acc)
    else:
        def kernel(wmu_ref, wrho_ref, p_ref, q_ref, p_acc, q_acc):
            compute(wmu_ref, wrho_ref, None, p_ref, q_ref, p_acc, q_acc)
    return kernel


def bayesian_log_probs(w_mu, w_rho, b_mu, b_rho, eps_w=None, eps_b=None, *,
                       pi=0.5, sigma_1=1.0, sigma_2=1e-6):
    """Returns (log_prior, log_q) of the (re-)sampled weight and bias."""
    sample = eps_w is not None
    if sample:
        assert eps_b is not None

    K, N = w_mu.shape
    tk = min(_round_up(K, 8), 512)
    tn = min(_round_up(N, 128), 512)
    Kp, Np = _round_up(K, tk), _round_up(N, tn)
    gk, gn = Kp // tk, Np // tn

    wmup = _pad2d(w_mu.astype(jnp.float32), Kp, Np)
    wrhop = _pad2d(w_rho.astype(jnp.float32), Kp, Np)

    w_spec = pl.BlockSpec((tk, tn), lambda kb, nb: (kb, nb))
    out_spec = pl.BlockSpec((1, 8, 128), lambda kb, nb: (kb, 0, 0))

    if sample:
        epswp = _pad2d(eps_w.astype(jnp.float32), Kp, Np)
        inputs = (wmup, wrhop, epswp)
        in_specs = [w_spec, w_spec, w_spec]
    else:
        inputs = (wmup, wrhop)
        in_specs = [w_spec, w_spec]

    kernel = _make_logprob_kernel(pi, sigma_1, sigma_2, K, N, tk, tn, sample)
    n_elems = Kp * Np

    p_part, q_part = pl.pallas_call(
        kernel,
        out_shape=(jax.ShapeDtypeStruct((gk, 8, 128), jnp.float32),
                   jax.ShapeDtypeStruct((gk, 8, 128), jnp.float32)),
        grid_spec=pltpu.PrefetchScalarGridSpec(
            num_scalar_prefetch=0,
            grid=(gk, gn),
            in_specs=in_specs,
            out_specs=(out_spec, out_spec),
            scratch_shapes=[pltpu.VMEM((tk, tn), jnp.float32),
                            pltpu.VMEM((tk, tn), jnp.float32)],
        ),
        compiler_params=pltpu.CompilerParams(
            # kb is parallel -> per-kb partial sums can shard across v7x's two
            # TensorCores; nb is the sequential accumulation axis.
            dimension_semantics=("parallel", "arbitrary"),
            vmem_limit_bytes=_VMEM_LIMIT_BYTES,
        ),
        cost_estimate=pl.CostEstimate(
            flops=20 * n_elems,
            transcendentals=6 * n_elems,
            bytes_accessed=4 * ((3 if sample else 2) * n_elems + 2 * gk * 8 * 128)),
    )(*inputs)

    log_prior_w = jnp.sum(p_part[:, 0, 0]) / float(K * N)
    log_q_w = jnp.sum(q_part[:, 0, 0]) / float(K * N)

    # Bias terms are O(N): plain JAX elementwise + mean (not worth a second
    # HBM pass / kernel).
    pi_f, c1, k1, c2, k2 = _mixture_constants(pi, sigma_1, sigma_2)
    b_mu_f = b_mu.astype(jnp.float32).reshape(-1)
    b_rho_f = b_rho.astype(jnp.float32).reshape(-1)
    sigma_b = _softplus(b_rho_f)
    if sample:
        diff_b = eps_b.astype(jnp.float32).reshape(-1) * sigma_b
    else:
        diff_b = jnp.zeros_like(b_mu_f)
    b = b_mu_f + diff_b
    b2 = b * b
    log_prior_b = jnp.mean(jnp.log(pi_f * jnp.exp(c1 - k1 * b2)
                                   + (1.0 - pi_f) * jnp.exp(c2 - k2 * b2) + 1e-10))
    log_q_b = jnp.mean(-_HALF_LOG_2PI - jnp.log(sigma_b + 1e-10)
                       - diff_b * diff_b / (2.0 * sigma_b * sigma_b + 1e-10))

    return log_prior_w + log_prior_b, log_q_w + log_q_b


# ---------------------------------------------------------------------------
# Module equivalent
# ---------------------------------------------------------------------------
class BayesianLinearPallas:
    """JAX/Pallas re-implementation of BayesianLinear's forward pass."""

    def __init__(self, input_dim, output_dim, pi=0.5, sigma_1=1.0,
                 sigma_2=1e-6, param_key=None):
        self.input_dim = input_dim
        self.output_dim = output_dim
        self.pi = pi
        self.sigma_1 = sigma_1
        self.sigma_2 = sigma_2
        self.init_rho = -3.0
        self.training = False

        key = jax.random.PRNGKey(0) if param_key is None else param_key
        # reset_parameters(): w_mu ~ N(0, 0.1^2), w_rho = b_rho = -3, b_mu = 0
        self.w_mu = 0.1 * jax.random.normal(key, (input_dim, output_dim),
                                            dtype=jnp.float32)
        self.w_rho = jnp.full((input_dim, output_dim), self.init_rho,
                              dtype=jnp.float32)
        self.b_mu = jnp.zeros((output_dim,), dtype=jnp.float32)
        self.b_rho = jnp.full((output_dim,), self.init_rho, dtype=jnp.float32)
        self.log_prior = None
        self.log_q = None

    def __call__(self, x, sample=False, calculate_log_probs=False, rng=None):
        do_sample = self.training or sample
        if do_sample:
            rng = jax.random.PRNGKey(1) if rng is None else rng
            kw, kb = jax.random.split(rng)
            eps_w = jax.random.normal(kw, self.w_mu.shape, dtype=jnp.float32)
            eps_b = jax.random.normal(kb, (self.output_dim,), dtype=jnp.float32)
        else:
            eps_w = eps_b = None

        if self.training or calculate_log_probs:
            self.log_prior, self.log_q = bayesian_log_probs(
                self.w_mu, self.w_rho, self.b_mu, self.b_rho, eps_w, eps_b,
                pi=self.pi, sigma_1=self.sigma_1, sigma_2=self.sigma_2)

        return bayesian_linear_forward(x, self.w_mu, self.w_rho,
                                       self.b_mu, self.b_rho, eps_w, eps_b)


# ---------------------------------------------------------------------------
# Demo / self-check
# ---------------------------------------------------------------------------
if __name__ == "__main__":
    root = jax.random.PRNGKey(0)
    k_x, k_param, k_noise, k_x2 = jax.random.split(root, 4)

    batch, input_dim, output_dim = 8, 32, 16
    x = jax.random.normal(k_x, (batch, input_dim), dtype=jnp.float32)
    layer = BayesianLinearPallas(input_dim, output_dim, param_key=k_param)

    def ref_softplus(rho):
        return jnp.log(1.0 + jnp.exp(rho))

    def ref_glogp(w, mu, sigma):
        return (-0.5 * math.log(2.0 * math.pi) - jnp.log(sigma + 1e-10)
                - (w - mu) ** 2 / (2.0 * sigma ** 2 + 1e-10))

    def ref_mixture(w, pi, s1, s2):
        p1 = jnp.exp(ref_glogp(w, 0.0, jnp.float32(s1)))
        p2 = jnp.exp(ref_glogp(w, 0.0, jnp.float32(s2)))
        return jnp.log(pi * p1 + (1.0 - pi) * p2 + 1e-10).mean()

    # 1) Eval-mode forward (deterministic weights) vs plain JAX.
    #    bf16 MXU feed -> relaxed tolerance vs the f32 reference.
    y_eval = layer(x, sample=False, calculate_log_probs=False)
    jax.block_until_ready(y_eval)
    y_eval_ref = x @ layer.w_mu + layer.b_mu[None, :]
    np.testing.assert_allclose(np.asarray(y_eval), np.asarray(y_eval_ref),
                               rtol=2e-2, atol=2e-2)

    # 2) Sampled forward (fused in-kernel sampling) + log-probs vs plain JAX.
    y_s = layer(x, sample=True, calculate_log_probs=True, rng=k_noise)
    jax.block_until_ready(y_s)
    jax.block_until_ready(layer.log_prior)
    jax.block_until_ready(layer.log_q)

    kw, kb = jax.random.split(k_noise)
    eps_w = jax.random.normal(kw, (input_dim, output_dim), dtype=jnp.float32)
    eps_b = jax.random.normal(kb, (output_dim,), dtype=jnp.float32)
    sig_w = ref_softplus(layer.w_rho)
    sig_b = ref_softplus(layer.b_rho)
    w_s = layer.w_mu + eps_w * sig_w
    b_s = layer.b_mu + eps_b * sig_b
    y_s_ref = x @ w_s + b_s[None, :]
    log_prior_ref = (ref_mixture(w_s, layer.pi, layer.sigma_1, layer.sigma_2)
                     + ref_mixture(b_s, layer.pi, layer.sigma_1, layer.sigma_2))
    log_q_ref = (ref_glogp(w_s, layer.w_mu, sig_w).mean()
                 + ref_glogp(b_s, layer.b_mu, sig_b).mean())

    np.testing.assert_allclose(np.asarray(y_s), np.asarray(y_s_ref),
                               rtol=2e-2, atol=2e-2)
    np.testing.assert_allclose(float(layer.log_prior), float(log_prior_ref),
                               rtol=5e-4, atol=5e-4)
    np.testing.assert_allclose(float(layer.log_q), float(log_q_ref),
                               rtol=5e-4, atol=5e-4)
    assert y_s.shape == (batch, output_dim)
    assert bool(jnp.isfinite(layer.log_prior)) and bool(jnp.isfinite(layer.log_q))

    # 3) Large-M sampled forward -> exercises the materialize-W-once path.
    big_m, big_k, big_n = 1536, 64, 48
    layer2 = BayesianLinearPallas(big_k, big_n,
                                  param_key=jax.random.fold_in(k_param, 1))
    x2 = jax.random.normal(k_x2, (big_m, big_k), dtype=jnp.float32)
    rng2 = jax.random.fold_in(k_noise, 1)
    y2 = layer2(x2, sample=True, calculate_log_probs=False, rng=rng2)
    jax.block_until_ready(y2)

    kw2, kb2 = jax.random.split(rng2)
    eps_w2 = jax.random.normal(kw2, (big_k, big_n), dtype=jnp.float32)
    eps_b2 = jax.random.normal(kb2, (big_n,), dtype=jnp.float32)
    w_s2 = layer2.w_mu + eps_w2 * ref_softplus(layer2.w_rho)
    b_s2 = layer2.b_mu + eps_b2 * ref_softplus(layer2.b_rho)
    y2_ref = x2 @ w_s2 + b_s2[None, :]
    np.testing.assert_allclose(np.asarray(y2), np.asarray(y2_ref),
                               rtol=2e-2, atol=3e-2)
    assert y2.shape == (big_m, big_n)

    print("KERNEL_OK")
</pallas_src>

<mosaic_0001>
module attributes {stable_mosaic.version = 11 : i64} {
  func.func @kernel(%arg0: i32, %arg1: i32, %arg2: i32, %arg3: memref<8x128xf32, #tpu.memory_space<vmem>>, %arg4: memref<128x128xf32, #tpu.memory_space<vmem>>, %arg5: memref<1x128xf32, #tpu.memory_space<vmem>>, %arg6: memref<8x128xf32, #tpu.memory_space<vmem>>) attributes {dimension_semantics = [#tpu.dimension_semantics<parallel>, #tpu.dimension_semantics<parallel>, #tpu.dimension_semantics<arbitrary>], iteration_bounds = array<i64: 1, 1, 1>, scalar_prefetch = 0 : i64, scratch_operands = 0 : i64, tpu.core_type = #tpu.core_type<tc>, window_params = [{transform_indices = @transform_0, window_bounds = array<i64: 8, 128>}, {transform_indices = @transform_1, window_bounds = array<i64: 128, 128>}, {transform_indices = @transform_2, window_bounds = array<i64: 1, 128>}, {transform_indices = @transform_3, window_bounds = array<i64: 8, 128>}]} {
    %c0_i32 = arith.constant 0 : i32
    %0 = arith.cmpi eq, %arg2, %c0_i32 : i32
    %1 = arith.extui %0 : i1 to i32
    %c0_i32_0 = arith.constant 0 : i32
    %2 = arith.cmpi ne, %1, %c0_i32_0 : i32
    scf.if %2 {
      %cst_10 = arith.constant 0.000000e+00 : f32
      %14 = vector.broadcast %cst_10 : f32 to vector<8x128xf32>
      %c0_11 = arith.constant 0 : index
      %c0_12 = arith.constant 0 : index
      %15 = vector.load %arg6[%c0_11, %c0_12] : memref<8x128xf32, #tpu.memory_space<vmem>>, vector<8x128xf32>
      tpu.vector_store %arg6[%c0_11, %c0_12], %14 {strides = array<i32>} : memref<8x128xf32, #tpu.memory_space<vmem>>, vector<8x128xf32>,
    } else {
    }
    %c0 = arith.constant 0 : index
    %c0_1 = arith.constant 0 : index
    %3 = vector.load %arg6[%c0, %c0_1] : memref<8x128xf32, #tpu.memory_space<vmem>>, vector<8x128xf32>
    %c0_2 = arith.constant 0 : index
    %c0_3 = arith.constant 0 : index
    %4 = vector.load %arg3[%c0_2, %c0_3] : memref<8x128xf32, #tpu.memory_space<vmem>>, vector<8x128xf32>
    %5 = arith.truncf %4 : vector<8x128xf32> to vector<8x128xbf16>
    %c0_4 = arith.constant 0 : index
    %c0_5 = arith.constant 0 : index
    %6 = vector.load %arg4[%c0_4, %c0_5] : memref<128x128xf32, #tpu.memory_space<vmem>>, vector<128x128xf32>
    %7 = arith.truncf %6 : vector<128x128xf32> to vector<128x128xbf16>
    %cst = arith.constant dense<0.000000e+00> : vector<8x128xf32>
    %8 = tpu.matmul %5, %7, %cst {dimension_numbers = #tpu.dot_dimension_numbers<[1], [0], [0], [1], [0, 0, 1, 1], [], []>} : vector<8x128xbf16>, vector<128x128xbf16>, vector<8x128xf32> -> vector<8x128xf32>
    %9 = arith.addf %3, %8 : vector<8x128xf32>
    %c0_6 = arith.constant 0 : index
    %c0_7 = arith.constant 0 : index
    %10 = vector.load %arg6[%c0_6, %c0_7] : memref<8x128xf32, #tpu.memory_space<vmem>>, vector<8x128xf32>
    tpu.vector_store %arg6[%c0_6, %c0_7], %9 {strides = array<i32>} : memref<8x128xf32, #tpu.memory_space<vmem>>, vector<8x128xf32>,
    %c0_i32_8 = arith.constant 0 : i32
    %11 = arith.cmpi eq, %arg2, %c0_i32_8 : i32
    %12 = arith.extui %11 : i1 to i32
    %c0_i32_9 = arith.constant 0 : i32
    %13 = arith.cmpi ne, %12, %c0_i32_9 : i32
    scf.if %13 {
      %c0_10 = arith.constant 0 : index
      %c0_11 = arith.constant 0 : index
      %14 = vector.load %arg6[%c0_10, %c0_11] : memref<8x128xf32, #tpu.memory_space<vmem>>, vector<8x128xf32>
      %c0_12 = arith.constant 0 : index
      %c0_13 = arith.constant 0 : index
      %15 = vector.load %arg5[%c0_12, %c0_13] : memref<1x128xf32, #tpu.memory_space<vmem>>, vector<1x128xf32>
      %16 = vector.broadcast %15 : vector<1x128xf32> to vector<8x128xf32>
      %17 = arith.addf %14, %16 : vector<8x128xf32>
      %c0_14 = arith.constant 0 : index
      %c0_15 = arith.constant 0 : index
      %18 = vector.load %arg6[%c0_14, %c0_15] : memref<8x128xf32, #tpu.memory_space<vmem>>, vector<8x128xf32>
      tpu.vector_store %arg6[%c0_14, %c0_15], %17 {strides = array<i32>} : memref<8x128xf32, #tpu.memory_space<vmem>>, vector<8x128xf32>,
    } else {
    }
    return
  }
  func.func @transform_0(%arg0: i32, %arg1: i32, %arg2: i32) -> (i32, i32) {
    %c0_i32 = arith.constant 0 : i32
    return %arg0, %arg2 : i32, i32
  }
  func.func @transform_1(%arg0: i32, %arg1: i32, %arg2: i32) -> (i32, i32) {
    %c0_i32 = arith.constant 0 : i32
    return %arg2, %arg1 : i32, i32
  }
  func.func @transform_2(%arg0: i32, %arg1: i32, %arg2: i32) -> (i32, i32) {
    %c0_i32 = arith.constant 0 : i32
    %c0_i32_0 = arith.constant 0 : i32
    return %c0_i32, %arg1 : i32, i32
  }
  func.func @transform_3(%arg0: i32, %arg1: i32, %arg2: i32) -> (i32, i32) {
    %c0_i32 = arith.constant 0 : i32
    return %arg0, %arg1 : i32, i32
  }
}

</mosaic_0001>

<bundles_post_ra>
// kernel: tpu_custom_call.1
= control target key start
LH: loop header
LB: loop body
LE: loop exit
PB: predicated region body
PF: predicated region fallthrough
CT: control target
= control target key end

     0   :  { %8 = vsyncpa [#allocation3], 0  ;;  %s287_s0 = inlined_call_operand.hbm [shape: f32[8,128], index: 0, kind: input, shape index: {}]   ;;  %s288_s1 = inlined_call_operand.hbm [shape: f32[128,128], index: 1, kind: input, shape index: {}]   ;;  %s289_s2 = inlined_call_operand.vmem [shape: f32[1,128], index: 2, kind: input, shape index: {}]   ;;  %s290_s3 = inlined_call_operand.hbm [shape: f32[8,128], index: 3, kind: output, shape index: {}]  }
   0x1   :  { %9 = vsyncpa [#allocation6], 0 }
   0x2   :  { %10 = vsyncpa [#allocation4], 0  ;;  %s248_s12 = smov [#allocation2]   ;;  %s249_s14 = smov [#allocation5]  }
   0x3   :  { %s17_s13 = sshll.u32 %s248_s12, 4  ;;  %s26_s15 = sshll.u32 %s249_s14, 4  ;;  %s18_s13 = int_to_ptr.vmem [resolvable:$true] %s17_s13  ;;  %s27_s15 = int_to_ptr.vmem [resolvable:$true] %s26_s15 }
   0x4   :  { %s190_s16 = scalar_lea.vmem %s18_s13, 128  ;;  %p195_p1 = scmp.lt.s32.totalorder %s18_s13, %s18_s13 }
   0x5   :  { %p191_p0 = scmp.ne.s32.totalorder %s18_s13, %s190_s16  ;;  %p196_p2 = scmp.lt.s32.totalorder %s190_s16, %s190_s16 }
   0x7   :  { %p197_p3 = por %p196_p2, %p195_p1 }
   0x9   :  { %p198_p4 = pnand %p197_p3, %p191_p0 }
   0xb   :  { %201 = shalt.err (!%p198_p4)
}
   0xc   :  { %20 = dma.hbm_to_vmem [thread:$0]  %s287_s0, 128, %s18_s13, [#allocation3]  }
   0xd   :  { %s210_s19 = scalar_lea.vmem %s27_s15, 2048  ;;  %p215_p6 = scmp.lt.s32.totalorder %s27_s15, %s27_s15 }
   0xe   :  { %p211_p5 = scmp.ne.s32.totalorder %s27_s15, %s210_s19  ;;  %p216_p7 = scmp.lt.s32.totalorder %s210_s19, %s210_s19 }
  0x10   :  { %p217_p8 = por %p216_p7, %p215_p6 }
  0x12   :  { %p218_p9 = pnand %p217_p8, %p211_p5 }
  0x14   :  { %221 = shalt.err (!%p218_p9)
}
  0x15   :  { %s250_s20 = smov 128   ;;  %s251_s21 = smov 8  }
  0x16   :  { %32 = dma.hbm_to_vmem [thread:$0]  %s288_s1, 2048, %s27_s15, [#allocation6], %s250_s20, %s250_s20, %s251_s21  }
  0x17   :  { %242 = dma.done.wait [#allocation3], 128  }
  0x18   :  { %243 = vsyncadd [#allocation3], 4294967168 }
  0x19   :  { %244 = dma.done.wait [#allocation6], 2048  }
  0x1a   :  { %245 = vsyncadd [#allocation6], 4294965248  ;;  %v252_v0 = vmov 0.0   ;;  %vm253_vm0 = vmmov 0   ;;  %v64_v1 = vld [vmem:[#allocation5 + $0x70] sm:$0xff]  ;;  %v65_v2 = vld [vmem:[#allocation5 + $0x78] sm:$0xff] }
  0x1b   :  { %155 = vmatprep.subr.bf16.mxu0 %v252_v0  ;;  %171 = vmatprep.mubr.msk.bf16.mxu0 %vm253_vm0, %v252_v0  ;;  %v62_v3 = vld [vmem:[#allocation5 + $0x60] sm:$0xff]  ;;  %v73_v4 = vpack.c.bf16 %v65_v2, %v64_v1  ;;  %v63_v5 = vld [vmem:[#allocation5 + $0x68] sm:$0xff]  ;;  %v60_v7 = vld [vmem:[#allocation5 + $0x50] sm:$0xff]  ;;  %s254_s24 = smov [#allocation7]  }
  0x1c   :  { %v72_v6 = vpack.c.bf16 %v63_v5, %v62_v3  ;;  %v61_v8 = vld [vmem:[#allocation5 + $0x58] sm:$0xff]  ;;  %v58_v10 = vld [vmem:[#allocation5 + $0x40] sm:$0xff]  ;;  %v59_v11 = vld [vmem:[#allocation5 + $0x48] sm:$0xff]  ;;  %s135_s25 = sshll.u32 %s254_s24, 4  ;;  %s136_s25 = int_to_ptr.vmem [resolvable:$true] %s135_s25 }
  0x1d   :  { %156 = vmatpush3.bf16.msra.mxu0 %v73_v4  ;;  %v71_v9 = vpack.c.bf16 %v61_v8, %v60_v7  ;;  %v70_v12 = vpack.c.bf16 %v59_v11, %v58_v10  ;;  %v56_v13 = vld [vmem:[#allocation5 + $0x30] sm:$0xff]  ;;  %v57_v14 = vld [vmem:[#allocation5 + $0x38] sm:$0xff]  ;;  %v54_v16 = vld [vmem:[#allocation5 + $0x20] sm:$0xff]  ;;  %s222_s26 = scalar_lea.vmem %s136_s25, 128  ;;  %p227_p11 = scmp.lt.s32.totalorder %s136_s25, %s136_s25 }
  0x1e   :  { %157 = vmatprep.subr.bf16.mxu0 %v252_v0  ;;  %v69_v15 = vpack.c.bf16 %v57_v14, %v56_v13  ;;  %v55_v17 = vld [vmem:[#allocation5 + $0x28] sm:$0xff]  ;;  %v52_v19 = vld [vmem:[#allocation5 + $0x10] sm:$0xff]  ;;  %v53_v20 = vld [vmem:[#allocation5 + $0x18] sm:$0xff]  ;;  %p223_p10 = scmp.ne.s32.totalorder %s136_s25, %s222_s26  ;;  %p228_p12 = scmp.lt.s32.totalorder %s222_s26, %s222_s26 }
  0x1f   :  { %v68_v18 = vpack.c.bf16 %v55_v17, %v54_v16  ;;  %v67_v21 = vpack.c.bf16 %v53_v20, %v52_v19  ;;  %v50_v22 = vld [vmem:[#allocation5] sm:$0xff]  ;;  %v51_v23 = vld [vmem:[#allocation5 + $0x8] sm:$0xff]  ;;  %v48_v25 = vld [vmem:[#allocation2] sm:$0xff] }
  0x20   :  { %v66_v24 = vpack.c.bf16 %v51_v23, %v50_v22  ;;  %v49_v26 = vpack.c.bf16 %v48_v25, %v48_v25  ;;  %v145_v28 = vld [vmem:[%s289_s2] ss:$0 sm:$0xff]  ;;  %p229_p13 = por %p228_p12, %p227_p11 }
  0x21   :  { %158 = vmatpush3.bf16.msra.mxu0 %v72_v6 }
  0x22   :  { %159 = vmatprep.subr.bf16.mxu0 %v252_v0  ;;  %p230_p0 = pnand %p229_p13, %p223_p10 }
  0x25   :  { %160 = vmatpush3.bf16.msra.mxu0 %v71_v9 }
  0x26   :  { %161 = vmatprep.subr.bf16.mxu0 %v252_v0 }
  0x29   :  { %162 = vmatpush3.bf16.msra.mxu0 %v70_v12 }
  0x2a   :  { %163 = vmatprep.subr.bf16.mxu0 %v252_v0 }
  0x2d   :  { %164 = vmatpush3.bf16.msra.mxu0 %v69_v15 }
  0x2e   :  { %165 = vmatprep.subr.bf16.mxu0 %v252_v0 }
  0x31   :  { %166 = vmatpush3.bf16.msra.mxu0 %v68_v18 }
  0x32   :  { %167 = vmatprep.subr.bf16.mxu0 %v252_v0 }
  0x35   :  { %168 = vmatpush3.bf16.msra.mxu0 %v67_v21 }
  0x36   :  { %169 = vmatprep.subr.bf16.mxu0 %v252_v0 }
  0x39   :  { %170 = vmatpush3.bf16.msra.mxu0 %v66_v24 }
  0x3c   :  { %172 = vmatmul.mubr.bf16.vlgmr.msra.gmra.mxu0 %v49_v26 }
  0xfc   :  { %v108_v27 = vpop.f32.mrf.mxu0 }
  0xfd   :  { %v127_v30 = vadd.f32 %v145_v28, %v108_v27 }
  0xfe   :  { %v173_v29 = vpop.f32.mrf.mxu0 }
  0xff   :  { %128 = vst [vmem:[#allocation7] sm:$0xff] %v127_v30 }
 0x100   :  { %v111_v31 = vpop.f32.mrf.mxu0 }
 0x102   :  { %v174_v32 = vpop.f32.mrf.mxu0 }
 0x103   :  { %233 = shalt.err (!%p230_p0)
}
 0x104   :  { %138 = dma.vmem_to_hbm [thread:$0]  %s136_s25, 128, %s290_s3, [#allocation4]  }
 0x105   :  { %246 = dma.done.wait [#allocation4], 128  }
 0x106   :  { %247 = vsyncadd [#allocation4], 4294967168 }
 0x107   :  { %142 = vsyncpa [#allocation3], 1 }
 0x108   :  { %143 = vsyncpa [#allocation6], 1 }
 0x109   :  { %144 = vsyncpa [#allocation4], 1 }

</bundles_post_ra>
